<compile_context>
chip_gen: v5e
topology: v5e:2x2
jax: 0.10.0
libtpu: 0.0.40
codegen_flags: <defaults>
</compile_context>

<pallas_src>
import jax
import jax.numpy as jnp
from jax.experimental import pallas as pl
from jax.experimental.pallas import tpu as pltpu


def _make_residual_kernel(C, use_mxu):
    def kernel(x_ref, wt_ref, b_ref, o_ref):
        # x_ref : (C, THW) lane-dense tile of one image (N dim squeezed away)
        # wt_ref: (C, C) transposed weight, wt[d, c] = w[c, d]
        # b_ref : (C, 1) bias
        x = x_ref[...]
        xf = x.astype(jnp.float32)
        if use_mxu:
            # y[d, :] = sum_c wt[d, c] * x[c, :]   (MXU, f32 accumulate)
            y = jnp.dot(wt_ref[...], x, preferred_element_type=jnp.float32)
        else:
            # Tiny C: C rank-1 VPU FMAs keep the kernel purely bandwidth-limited.
            wt = wt_ref[...].astype(jnp.float32)
            y = wt[:, 0:1] * xf[0:1, :]
            for c in range(1, C):
                y = y + wt[:, c:c + 1] * xf[c:c + 1, :]
        y = y + b_ref[...].astype(jnp.float32)          # (C, 1) lane-broadcast
        # Residual.forward: fn(x) + x   (fused residual add)
        o_ref[...] = (y + xf).astype(o_ref.dtype)
    return kernel


def _pick_tile_hw(hw, max_tile_hw):
    """Largest multiple of 128 dividing hw (capped), else the full extent."""
    if hw % 128 == 0 and hw > max_tile_hw:
        best = 128
        for t in range(128, max_tile_hw + 1, 128):
            if hw % t == 0:
                best = t
        return best
    # hw fits in one lane-dense tile, or block == full dim satisfies (8,128) rule.
    # TODO(synk): ragged-tail tiling for very large H*W not divisible by 128.
    return hw


def residual_pointwise(x_nchw, w, b, *, max_tile_hw=2048):
    """Residual(fn)(x) with fn = pointwise channel mix; x stays in native NCHW."""
    N, C, H, W = x_nchw.shape
    HW = H * W
    x3d = x_nchw.reshape(N, C, HW)      # contiguous collapse, no data movement
    wt = jnp.transpose(w)               # (C, C) tiny transpose: wt[d, c] = w[c, d]
    b2 = b.reshape(C, 1)

    tile_hw = _pick_tile_hw(HW, max_tile_hw)
    grid = (N, HW // tile_hw)
    use_mxu = C >= 128

    dsize = x_nchw.dtype.itemsize
    x_blk_bytes = C * tile_hw * dsize
    w_bytes = C * C * w.dtype.itemsize + C * b.dtype.itemsize
    # Double-buffered in/out blocks + resident weight/bias + slack; capped at
    # 64 MiB so it still compiles on v7x (64 MiB physical VMEM).
    vmem_limit = int(min(max(6 * x_blk_bytes + 2 * w_bytes + (2 << 20), 16 << 20),
                         64 << 20))
    # TODO(synk): for very large C (e.g. >= 4096 f32) the resident (C, C) weight
    # no longer fits v7x VMEM; add a K-tiled grid axis or bf16 weights there.

    flops = 2 * N * HW * C * C + N * HW * C
    bytes_accessed = 2 * N * C * HW * dsize + w_bytes
    cost = pl.CostEstimate(flops=flops, transcendentals=0,
                           bytes_accessed=bytes_accessed)

    out3d = pl.pallas_call(
        _make_residual_kernel(C, use_mxu),
        out_shape=jax.ShapeDtypeStruct((N, C, HW), x_nchw.dtype),
        grid_spec=pltpu.PrefetchScalarGridSpec(
            num_scalar_prefetch=0,
            grid=grid,
            in_specs=[
                pl.BlockSpec((None, C, tile_hw), lambda n, j: (n, 0, j)),  # x tile
                pl.BlockSpec((C, C), lambda n, j: (0, 0)),                 # wT (resident)
                pl.BlockSpec((C, 1), lambda n, j: (0, 0)),                 # bias
            ],
            out_specs=pl.BlockSpec((None, C, tile_hw), lambda n, j: (n, 0, j)),
        ),
        compiler_params=pltpu.CompilerParams(
            dimension_semantics=("parallel", "parallel"),
            vmem_limit_bytes=vmem_limit),
        cost_estimate=cost,
    )(x3d, wt, b2)

    return out3d.reshape(N, C, H, W)


def _residual_ref(x, w, b):
    # Pure-JAX reference of Residual(fn): fn(x) + x, in native NCHW.
    y = jnp.einsum("nchw,cd->ndhw", x, w, precision=jax.lax.Precision.HIGHEST)
    return y + b[None, :, None, None] + x


if __name__ == "__main__":
    # --- Test 1: tiny C (VPU rank-1 FMA path), nominal small shapes ---
    kx, kw, kb = jax.random.split(jax.random.PRNGKey(0), 3)
    N, C, H, W = 2, 4, 16, 16
    x = jax.random.normal(kx, (N, C, H, W), dtype=jnp.float32)
    w = jax.random.normal(kw, (C, C), dtype=jnp.float32) * 0.1
    b = jax.random.normal(kb, (C,), dtype=jnp.float32) * 0.1

    out = jax.block_until_ready(residual_pointwise(x, w, b))
    ref = _residual_ref(x, w, b)
    assert out.shape == x.shape and out.dtype == x.dtype
    assert jnp.allclose(out, ref, atol=1e-5, rtol=1e-5)

    # --- Test 2: C >= 128 (fused MXU path) ---
    kx2, kw2, kb2 = jax.random.split(jax.random.PRNGKey(1), 3)
    N2, C2, H2, W2 = 2, 128, 16, 16
    x2 = jax.random.normal(kx2, (N2, C2, H2, W2), dtype=jnp.float32)
    w2 = jax.random.normal(kw2, (C2, C2), dtype=jnp.float32) * 0.1
    b2 = jax.random.normal(kb2, (C2,), dtype=jnp.float32) * 0.1

    out2 = jax.block_until_ready(residual_pointwise(x2, w2, b2))
    ref2 = _residual_ref(x2, w2, b2)
    # MXU default-precision passes -> looser tolerance than the exact-f32 VPU path.
    assert jnp.allclose(out2, ref2, atol=2e-2, rtol=2e-2)

    print("KERNEL_OK")
</pallas_src>

<mosaic_0001>
module attributes {stable_mosaic.version = 11 : i64} {
  func.func @kernel(%arg0: i32, %arg1: i32, %arg2: memref<1x4x256xf32, #tpu.memory_space<vmem>>, %arg3: memref<4x4xf32, #tpu.memory_space<vmem>>, %arg4: memref<4x1xf32, #tpu.memory_space<vmem>>, %arg5: memref<1x4x256xf32, #tpu.memory_space<vmem>>) attributes {dimension_semantics = [#tpu.dimension_semantics<parallel>, #tpu.dimension_semantics<parallel>], iteration_bounds = array<i64: 2, 1>, scalar_prefetch = 0 : i64, scratch_operands = 0 : i64, tpu.core_type = #tpu.core_type<tc>, window_params = [{transform_indices = @transform_0, window_bounds = array<i64: 1, 4, 256>}, {pipeline_mode = #tpu.pipeline_mode<synchronous>, transform_indices = @transform_1, window_bounds = array<i64: 4, 4>}, {pipeline_mode = #tpu.pipeline_mode<synchronous>, transform_indices = @transform_2, window_bounds = array<i64: 4, 1>}, {transform_indices = @transform_3, window_bounds = array<i64: 1, 4, 256>}]} {
    %c0 = arith.constant 0 : index
    %c0_0 = arith.constant 0 : index
    %c0_1 = arith.constant 0 : index
    %0 = vector.load %arg2[%c0, %c0_0, %c0_1] : memref<1x4x256xf32, #tpu.memory_space<vmem>>, vector<1x4x256xf32>
    %1 = vector.shape_cast %0 : vector<1x4x256xf32> to vector<4x256xf32>
    %c0_2 = arith.constant 0 : index
    %c0_3 = arith.constant 0 : index
    %2 = vector.load %arg3[%c0_2, %c0_3] : memref<4x4xf32, #tpu.memory_space<vmem>>, vector<4x4xf32>
    %3 = vector.extract_strided_slice %2 {offsets = [0, 0], sizes = [4, 1], strides = [1, 1]} : vector<4x4xf32> to vector<4x1xf32>
    %4 = vector.extract_strided_slice %1 {offsets = [0, 0], sizes = [1, 256], strides = [1, 1]} : vector<4x256xf32> to vector<1x256xf32>
    %5 = vector.broadcast %3 : vector<4x1xf32> to vector<4x256xf32>
    %6 = vector.broadcast %4 : vector<1x256xf32> to vector<4x256xf32>
    %7 = arith.mulf %5, %6 : vector<4x256xf32>
    %8 = vector.extract_strided_slice %2 {offsets = [0, 1], sizes = [4, 1], strides = [1, 1]} : vector<4x4xf32> to vector<4x1xf32>
    %9 = vector.extract_strided_slice %1 {offsets = [1, 0], sizes = [1, 256], strides = [1, 1]} : vector<4x256xf32> to vector<1x256xf32>
    %10 = vector.broadcast %8 : vector<4x1xf32> to vector<4x256xf32>
    %11 = vector.broadcast %9 : vector<1x256xf32> to vector<4x256xf32>
    %12 = arith.mulf %10, %11 : vector<4x256xf32>
    %13 = arith.addf %7, %12 : vector<4x256xf32>
    %14 = vector.extract_strided_slice %2 {offsets = [0, 2], sizes = [4, 1], strides = [1, 1]} : vector<4x4xf32> to vector<4x1xf32>
    %15 = vector.extract_strided_slice %1 {offsets = [2, 0], sizes = [1, 256], strides = [1, 1]} : vector<4x256xf32> to vector<1x256xf32>
    %16 = vector.broadcast %14 : vector<4x1xf32> to vector<4x256xf32>
    %17 = vector.broadcast %15 : vector<1x256xf32> to vector<4x256xf32>
    %18 = arith.mulf %16, %17 : vector<4x256xf32>
    %19 = arith.addf %13, %18 : vector<4x256xf32>
    %20 = vector.extract_strided_slice %2 {offsets = [0, 3], sizes = [4, 1], strides = [1, 1]} : vector<4x4xf32> to vector<4x1xf32>
    %21 = vector.extract_strided_slice %1 {offsets = [3, 0], sizes = [1, 256], strides = [1, 1]} : vector<4x256xf32> to vector<1x256xf32>
    %22 = vector.broadcast %20 : vector<4x1xf32> to vector<4x256xf32>
    %23 = vector.broadcast %21 : vector<1x256xf32> to vector<4x256xf32>
    %24 = arith.mulf %22, %23 : vector<4x256xf32>
    %25 = arith.addf %19, %24 : vector<4x256xf32>
    %c0_4 = arith.constant 0 : index
    %c0_5 = arith.constant 0 : index
    %26 = vector.load %arg4[%c0_4, %c0_5] : memref<4x1xf32, #tpu.memory_space<vmem>>, vector<4x1xf32>
    %27 = vector.broadcast %26 : vector<4x1xf32> to vector<4x256xf32>
    %28 = arith.addf %25, %27 : vector<4x256xf32>
    %29 = arith.addf %28, %1 : vector<4x256xf32>
    %c0_6 = arith.constant 0 : index
    %c0_7 = arith.constant 0 : index
    %c0_8 = arith.constant 0 : index
    %30 = vector.load %arg5[%c0_6, %c0_7, %c0_8] : memref<1x4x256xf32, #tpu.memory_space<vmem>>, vector<1x4x256xf32>
    %31 = vector.shape_cast %30 : vector<1x4x256xf32> to vector<4x256xf32>
    %32 = vector.shape_cast %29 : vector<4x256xf32> to vector<1x4x256xf32>
    tpu.vector_store %arg5[%c0_6, %c0_7, %c0_8], %32 {strides = array<i32>} : memref<1x4x256xf32, #tpu.memory_space<vmem>>, vector<1x4x256xf32>,
    return
  }
  func.func @transform_0(%arg0: i32, %arg1: i32) -> (i32, i32, i32) {
    %c0_i32 = arith.constant 0 : i32
    %c0_i32_0 = arith.constant 0 : i32
    return %arg0, %c0_i32, %arg1 : i32, i32, i32
  }
  func.func @transform_1(%arg0: i32, %arg1: i32) -> (i32, i32) {
    %c0_i32 = arith.constant 0 : i32
    %c0_i32_0 = arith.constant 0 : i32
    %c0_i32_1 = arith.constant 0 : i32
    return %c0_i32, %c0_i32_0 : i32, i32
  }
  func.func @transform_2(%arg0: i32, %arg1: i32) -> (i32, i32) {
    %c0_i32 = arith.constant 0 : i32
    %c0_i32_0 = arith.constant 0 : i32
    %c0_i32_1 = arith.constant 0 : i32
    return %c0_i32, %c0_i32_0 : i32, i32
  }
  func.func @transform_3(%arg0: i32, %arg1: i32) -> (i32, i32, i32) {
    %c0_i32 = arith.constant 0 : i32
    %c0_i32_0 = arith.constant 0 : i32
    return %arg0, %c0_i32, %arg1 : i32, i32, i32
  }
}

</mosaic_0001>

<bundles_post_ra>
// kernel: tpu_custom_call.1
= control target key start
LH: loop header
LB: loop body
LE: loop exit
PB: predicated region body
PF: predicated region fallthrough
CT: control target
= control target key end

     0   :  { %8 = vsyncpa [#allocation3], 0  ;;  %s749_s0 = inlined_call_operand.hbm [shape: f32[2,4,256], index: 0, kind: input, shape index: {}]   ;;  %s750_s1 = inlined_call_operand.vmem [shape: f32[4,4], index: 1, kind: input, shape index: {}]   ;;  %s751_s2 = inlined_call_operand.vmem [shape: f32[4,1], index: 2, kind: input, shape index: {}]   ;;  %s752_s3 = inlined_call_operand.hbm [shape: f32[2,4,256], index: 3, kind: output, shape index: {}]  }
   0x1   :  { %10 = vsyncpa [#allocation3 + $0x1], 0 }
   0x2   :  { %11 = vsyncpa [#allocation4], 0 }
   0x3   :  { %13 = vsyncpa [#allocation4 + $0x1], 0  ;;  %s619_s12 = smov 0   ;;  %s621_s13 = smov 0  }
   0x4   :  { %s623_s14 = smov 0   ;;  %s625_s15 = smov 0  }
   0x5   :  { %s627_s16 = smov 0   ;;  %s629_s17 = smov 0  }
   0x6 LB: > { %s392_s18 = sadd.s32 4294967295, %s593_s17   ;;  %s393_s19 = sadd.s32 4294967294, %s593_s17   ;;  %s593_s17 = sphi %s629_s17, %s19_s17   ;;  %s589_s16 = sphi %s627_s16, %s761_s16   ;;  %s585_s15 = sphi %s625_s15, %s760_s15   ;;  %s581_s14 = sphi %s623_s14, %s759_s14   ;;  %s577_s13 = sphi %s621_s13, %s758_s13   ;;  %s573_s12 = sphi %s619_s12, %s757_s12  }
   0x7   : > { %s31_s20 = sadd.s32 1, %s589_s16  ;;  %s40_s21 = sadd.s32 1, %s581_s14 }
   0x8   : > { %p33_p0 = scmp.ge.s32.totalorder %s31_s20, 2  ;;  %p47_p1 = scmp.ne.s32.totalorder %s581_s14, %s577_s13 }
   0x9   : > { %p48_p2 = scmp.eq.s32.totalorder %s593_s17, 0  ;;  %p53_p3 = scmp.ne.s32.totalorder %s577_s13, %s573_s12 }
   0xa   : > { %s763_s20 = smov (%p33_p0, %s31_s20), 0  ;;  %p54_p5 = scmp.eq.s32.totalorder %s392_s18, 0 }
   0xb   : > { %p660_p4 = por %p48_p2, %p47_p1  ;;  %s35_s23 = ssub.s32 %s589_s16, %s763_s20 }
   0xc   : > { %p121_p6 = scmp.eq.s32.totalorder %s392_s18, 1  ;;  %p38_p7 = scmp.eq.s32.totalorder %s35_s23, 0 }
   0xd   : > { %p666_p8 = por %p54_p5, %p53_p3  ;;  %p127_p10 = scmp.eq.s32.totalorder %s393_s19, 1 }
   0xe   : > { %p670_p9 = por %p121_p6, %p47_p1  ;;  %p395_p12 = scmp.ge.s32.totalorder %s593_s17, 2 }
   0xf   : > { %s675_s26 = scalar_select %p38_p7, %s581_s14, %s40_s21  }
  0x10   : > { %p677_p11 = por %p127_p10, %p53_p3  ;;  %p421_p13 = scmp.lt.s32.totalorder %s593_s17, 2 }
  0x11   : > { %s153_s28 = sand.u32 1, %s581_s14   ;;  %s407_s30 = sshll.u32 %s589_s16, 3 }
  0x12   : > { %s396_s29 = sshll.u32 %s153_s28, 3  ;;  %s164_s6 = scalar_lea.hbm %s749_s0, %s407_s30 }
  0x13   : > { %s157_s7 = scalar_lea.vmem [#allocation2], %s396_s29  ;;  %s166_s9 = sshll.u32 %s164_s6, 4  ;;  %s167_s9 = int_to_ptr.hbm [resolvable:$true] %s166_s9 }
  0x14   : > { %s168_s8 = sshll.u32 %s157_s7, 4  ;;  %p414_p0 = pnand %p421_p13, %p660_p4  ;;  %s169_s8 = int_to_ptr.vmem [resolvable:$true] %s168_s8 }
  0x15   : > { %p399_p1 = scmp.ge.s32.totalorder %s593_s17, 1  ;;  %p173_p2 = scmp.lt.s32.totalorder %s593_s17, 3 }
  0x16   : > { %s154_s10 = scalar_lea.sflag [#allocation3], %s153_s28 }
  0x17   : > { %416 = dma.hbm_to_vmem [thread:$0]  (!%p414_p0), %s167_s9, 128, %s169_s8, %s154_s10  }
  0x18   : > { %p174_p3 = pnand %p399_p1, %p173_p2 }
  0x19   : > { %s693_s11 = sand.u32 (!%p174_p3), 1, %s577_s13  }
  0x1a   : > { %177 = sbr.rel (%p174_p3) target bundleno = 176 (0xb0), region = 32  ;;  %s400_s18 = sshll.u32 (!%p174_p3), %s693_s11, 3 }
  0x1b   : > { %s180_s19 = scalar_lea.sflag (!%p174_p3), [#allocation3], %s693_s11  ;;  %s183_s21 = scalar_lea.vmem (!%p174_p3), [#allocation2], %s400_s18 }
  0x1f   : > { %564 = dma.done.wait (%p666_p8), %s180_s19, 128  }
  0x20   : > { %566 = vsyncadd (%p666_p8), %s180_s19, 4294967168  ;;  %v595_v0 = vmov 0   ;;  %v596_v1 = vmov 2   ;;  %v209_v2 = vld [vmem:[%s183_s21] sm:$0xff]  ;;  %v210_v3 = vld [vmem:[%s750_s1] sm:$0xf] }
  0x21   : > { %475 = vset.pattern.permute.xlu0 %v595_v0  ;;  %477 = vset.pattern.permute.xlu1 %v596_v1  ;;  %v267_v4 = vld [vmem:[%s751_s2] sm:$0xf]  ;;  %275 = vst [vmem:[#allocation1] ss:$2 sm:$0xff] %v209_v2  ;;  %v597_v5 = vmov 1   ;;  %v598_v6 = vmov 3  }
  0x22   : > { %479 = vset.pattern.permute.xlu2 %v595_v0  ;;  %213 = vperm.xlu0 %475, %v210_v3   ;;  %v217_v9 = vperm.slane %v209_v2, 0  ;;  %v218_v10 = vperm.slane %v209_v2, 4  ;;  %v229_v11 = vperm.slane %v209_v2, 1  ;;  %v230_v12 = vperm.slane %v209_v2, 5  ;;  %s408_s24 = sshll.u32 %s585_s15, 3  ;;  %s206_s6 = scalar_lea.vmem [#allocation5], %s400_s18 }
  0x23   : > { %240 = vperm.xlu1 %477, %v210_v3   ;;  %270 = vperm.xlu2 %479, %v267_v4   ;;  %v243_v13 = vperm.slane %v209_v2, 2  ;;  %v244_v14 = vperm.slane %v209_v2, 6  ;;  %v257_v15 = vperm.slane %v209_v2, 3  ;;  %v258_v16 = vperm.slane %v209_v2, 7  ;;  %s303_s5 = scalar_lea.hbm %s752_s3, %s408_s24  ;;  %s305_s7 = sshll.u32 %s206_s6, 4  ;;  %s306_s7 = int_to_ptr.vmem [resolvable:$true] %s305_s7 }
  0x24   : > { %v221_v17 = vperm.slane %v217_v9, 0  ;;  %v222_v18 = vperm.slane %v218_v10, 0  ;;  %v233_v19 = vperm.slane %v229_v11, 1  ;;  %v234_v20 = vperm.slane %v230_v12, 1  ;;  %s307_s8 = sshll.u32 %s303_s5, 4  ;;  %s290_s15 = scalar_lea.sflag [#allocation4], %s693_s11  ;;  %s308_s8 = int_to_ptr.hbm [resolvable:$true] %s307_s8 }
  0x25   : > { %v247_v21 = vperm.slane %v243_v13, 2  ;;  %v248_v22 = vperm.slane %v244_v14, 2  ;;  %v261_v23 = vperm.slane %v257_v15, 3  ;;  %v262_v24 = vperm.slane %v258_v16, 3  ;;  %s525_s9 = sshra.s32 %s308_s8, 4  ;;  %s531_s18 = scalar_lea.hbm %s752_s3, 16  ;;  %s526_s9 = int_to_ptr.hbm [resolvable:$true] %s525_s9 }
  0x26   : > { %vm285_vm0 = vcmask 1043456   ;;  %s527_s10 = scalar_lea.hbm %s526_s9, 8  ;;  %p532_p7 = scmp.lt.s32.totalorder %s526_s9, %s752_s3 }
  0x27   : > { %p528_p4 = scmp.ne.s32.totalorder %s526_s9, %s527_s10  ;;  %p533_p8 = scmp.lt.s32.totalorder %s531_s18, %s527_s10 }
  0x28   : > { %v277_v42 = vld.sshfl [vmem:[#allocation1 + $0x8] sm:$0xff pattern:$0x75316420]  ;;  %v276_v45 = vld.sshfl [vmem:[#allocation1] sm:$0xff pattern:$0x75316420] }
  0x29   : > { %p529_p5 = pnand %p528_p4, %p670_p9  ;;  %p534_p10 = por %p533_p8, %p532_p7 }
  0x2a   : > { %476 = vset.pattern.permute.xlu0 %v597_v5 }
  0x2b   : > { %478 = vset.pattern.permute.xlu1 %v598_v6  ;;  %226 = vperm.xlu0 %476, %v210_v3   ;;  %p530_p6 = pneg %p529_p5 }
  0x2c   : > { %254 = vperm.xlu1 %478, %v210_v3  }
  0x2d   : > { %p535_p13 = pnand %p534_p10, %p530_p6 }
  0x33   : > { %480 = vset.pattern.permute.xlu0 %v595_v0 }
  0x7d   : > { %v271_v39 = vpop.permute.xlu2 %270 }
  0x94   : > { %v214_v7 = vpop.permute.xlu0 %213 }
  0x95   : > { %v241_v8 = vpop.permute.xlu1 %240  ;;  %v223_v27 = vmul.f32 %v221_v17, %v214_v7  ;;  %v224_v28 = vmul.f32 %v222_v18, %v214_v7 }
  0x96   : > { %v249_v31 = vmul.f32 %v247_v21, %v241_v8  ;;  %v250_v32 = vmul.f32 %v248_v22, %v241_v8 }
  0x9d   : > { %v227_v25 = vpop.permute.xlu0 %226 }
  0x9e   : > { %v255_v26 = vpop.permute.xlu1 %254  ;;  %v235_v29 = vmul.f32 %v233_v19, %v227_v25  ;;  %v236_v30 = vmul.f32 %v234_v20, %v227_v25 }
  0x9f   : > { %v263_v35 = vmul.f32 %v261_v23, %v255_v26  ;;  %v264_v36 = vmul.f32 %v262_v24, %v255_v26 }
  0xa0   : > { %v237_v33 = vadd.f32 %v235_v29, %v223_v27  ;;  %v238_v34 = vadd.f32 %v236_v30, %v224_v28 }
  0xa2   : > { %v251_v37 = vadd.f32 %v249_v31, %v237_v33  ;;  %v252_v38 = vadd.f32 %v250_v32, %v238_v34 }
  0xa4   : > { %v265_v40 = vadd.f32 %v263_v35, %v251_v37  ;;  %v266_v41 = vadd.f32 %v264_v36, %v252_v38 }
  0xa6   : > { %v273_v43 = vadd.f32 %v271_v39, %v265_v40  ;;  %v274_v44 = vadd.f32 %v271_v39, %v266_v41 }
  0xa8   : > { %v281_v46 = vadd.f32 %v277_v42, %v274_v44  ;;  %v280_v47 = vadd.f32 %v276_v45, %v273_v43 }
  0xaa   : > { %v284_v48 = vrot.slane %v281_v46, 4 }
  0xac   : > { %v286_v49 = vsel %vm285_vm0, %v280_v47, %v284_v48 }
  0xad   : > { %288 = vst [vmem:[%s206_s6] sm:$0xff] %v286_v49 }
  0xae   : > { %538 = shalt.err (!%p535_p13)
}
  0xaf   : > { %411 = dma.vmem_to_hbm [thread:$0]  (%p670_p9), %s306_s7, 128, %s308_s8, %s290_s15  }
  0xb0 PF: > { %s319_s11 = sand.u32 1, %s573_s12   ;;  %p418_p0 = pnand %p395_p12, %p677_p11 }
  0xb1   : > { %s320_s28 = scalar_lea.sflag [#allocation4], %s319_s11 }
  0xb2   : > { %p419_p1 = pneg %p418_p0 }
  0xb4   : > { %568 = dma.done.wait (%p419_p1), %s320_s28, 128  }
  0xb5   : > { %570 = vsyncadd (%p419_p1), %s320_s28, 4294967168  ;;  %s19_s17 = sadd.s32 1, %s593_s17   ;;  %s757_s12 = smov %s577_s13 }
  0xb6   : > { %p16_p2 = scmp.ge.s32.totalorder %s19_s17, 4   ;;  %s758_s13 = smov %s581_s14 }
  0xb7   : > { %s759_s14 = smov %s675_s26  ;;  %s760_s15 = smov %s589_s16 }
  0xb8   : > { %s761_s16 = smov %s763_s20  ;;  %18 = sbr.rel (!%p16_p2) target bundleno = 6 (0x6), region = 77 }
  0xbd   :  { %326 = vsyncpa [#allocation3], 1 }
  0xbe   :  { %328 = vsyncpa [#allocation3 + $0x1], 1 }
  0xbf   :  { %329 = vsyncpa [#allocation4], 1 }
  0xc0   :  { %331 = vsyncpa [#allocation4 + $0x1], 1 }

</bundles_post_ra>
